<compile_context>
chip_gen: v5e
topology: v5e:2x2
jax: 0.10.0
libtpu: 0.0.40
codegen_flags: <defaults>
</compile_context>

<pallas_src>
import jax
import jax.numpy as jnp
from jax.experimental import pallas as pl
from jax.experimental.pallas import tpu as pltpu


def _hygcn_kernel(x_ref, w_ref, bias_ref, o_ref):
    # x_ref:    (TB, N*F)      bf16  -- TB flattened (b, t) slabs
    # w_ref:    (N*F, N*Fout)  bf16  -- kron(P^T, Theta^T), grid-invariant
    # bias_ref: (1, N*Fout)    f32   -- bias tiled over nodes, grid-invariant
    # o_ref:    (TB, N*Fout)   f32
    acc = jnp.dot(x_ref[...], w_ref[...], preferred_element_type=jnp.float32)
    o_ref[...] = jnp.maximum(acc + bias_ref[...], 0.0).astype(o_ref.dtype)


def batch_hygcn_forward(X, adj, theta, bias, *, tile_rows=256):
    """X: (bs, ts, N, F) f32; adj: (N, E) f32; theta: (Fout, F); bias: (Fout,)."""
    bs, ts, N, F = X.shape
    Nn, E = adj.shape
    assert Nn == N
    Fout = theta.shape[0]

    # ---------------- grid-invariant precompute (pure JAX glue, runs once) ----------------
    adj_f = jnp.asarray(adj, jnp.float32)
    H = (adj_f != 0).astype(jnp.float32)                      # binary incidence (N, E)
    d = jnp.sum(adj_f, axis=1)                                # weighted node degree
    dinv = jnp.where(d != 0, 1.0 / d, 0.0)                    # (N,)
    bcnt = jnp.sum(H, axis=0)                                 # hyperedge cardinality
    binv = jnp.where(bcnt != 0, 1.0 / bcnt, 0.0)              # (E,)

    # N x N propagation matrix  P = D^{-1} (H W) B^{-1} H^T
    P = dinv[:, None] * ((adj_f * binv[None, :]) @ H.T)       # (N, N) f32

    theta_t = jnp.asarray(theta, jnp.float32).T               # (F, Fout)
    # Fuse node propagation + feature transform into a single grid-invariant GEMM operand:
    #   out_flat = x_flat @ kron(P^T, Theta^T)
    W_big = jnp.kron(P.T, theta_t).astype(jnp.bfloat16)       # (N*F, N*Fout)
    bias_big = jnp.tile(jnp.asarray(bias, jnp.float32), N).reshape(1, N * Fout)

    # ---------------- (b, t) batching / tiling ----------------
    BT = bs * ts
    NF, NFout = N * F, N * Fout
    TB = min(tile_rows, ((BT + 7) // 8) * 8)                  # rows per grid step, mult of 8
    n_tiles = -(-BT // TB)
    BT_pad = n_tiles * TB

    x2d = X.reshape(BT, NF).astype(jnp.bfloat16)
    if BT_pad != BT:
        x2d = jnp.concatenate(
            [x2d, jnp.zeros((BT_pad - BT, NF), jnp.bfloat16)], axis=0)

    out2d = pl.pallas_call(
        _hygcn_kernel,
        out_shape=jax.ShapeDtypeStruct((BT_pad, NFout), jnp.float32),
        grid_spec=pltpu.PrefetchScalarGridSpec(
            num_scalar_prefetch=0,
            grid=(n_tiles,),
            in_specs=[
                pl.BlockSpec((TB, NF), lambda i: (i, 0)),
                # Grid-invariant operands: constant index_map => same block every step
                # (fetched once; a second pipeline buffer is unnecessary but harmless
                # at this VMEM budget).
                pl.BlockSpec((NF, NFout), lambda i: (0, 0)),
                pl.BlockSpec((1, NFout), lambda i: (0, 0)),
            ],
            out_specs=pl.BlockSpec((TB, NFout), lambda i: (i, 0)),
        ),
        compiler_params=pltpu.CompilerParams(
            dimension_semantics=("parallel",),        # shards tiles across TCs on v7x
            vmem_limit_bytes=32 * 1024 * 1024,        # safe on v5e/v6e/v7x; budget << 4 MiB
        ),
    )(x2d, W_big, bias_big)

    return out2d[:BT].reshape(bs, ts, N, Fout)


def _reference(X, adj, theta, bias):
    """Pure-JAX f32 reference of the same math for a correctness check."""
    H = (adj != 0).astype(jnp.float32)
    d = adj.sum(axis=1)
    dinv = jnp.where(d != 0, 1.0 / d, 0.0)
    bc = H.sum(axis=0)
    binv = jnp.where(bc != 0, 1.0 / bc, 0.0)
    y = jnp.einsum("btnf,of->btno", X, theta)
    e = jnp.einsum("ne,btno->bteo", H, y) * binv[None, None, :, None]
    z = jnp.einsum("ne,bteo->btno", adj, e)
    out = dinv[None, None, :, None] * z + bias[None, None, None, :]
    return jnp.maximum(out, 0.0)


if __name__ == "__main__":
    bs, ts, N, E, hidden = 2, 3, 16, 8, 32   # in_dims of batch_hygcn is unused; conv is hidden->hidden

    key = jax.random.PRNGKey(0)
    k_x, k_h, k_w, k_theta = jax.random.split(key, 4)

    X = jax.random.normal(k_x, (bs, ts, N, hidden), dtype=jnp.float32)

    # Hypergraph: binary membership pattern times a positive per-hyperedge weight,
    # mirroring how the torch code reads adj.nonzero() / adj[row, col].
    memb = jax.random.bernoulli(k_h, 0.4, (N, E)).astype(jnp.float32)
    w_edge = jax.random.uniform(k_w, (E,), minval=0.5, maxval=1.5, dtype=jnp.float32)
    adj = memb * w_edge[None, :]

    # HypergraphConv params: lin = Linear(hidden, hidden, bias=False) glorot, bias = zeros.
    a = (6.0 / (hidden + hidden)) ** 0.5
    theta = jax.random.uniform(k_theta, (hidden, hidden), minval=-a, maxval=a, dtype=jnp.float32)
    bias = jnp.zeros((hidden,), dtype=jnp.float32)

    out = jax.block_until_ready(batch_hygcn_forward(X, adj, theta, bias))

    ref = _reference(X, adj, theta, bias)
    assert out.shape == (bs, ts, N, hidden)
    # bf16 MXU inputs with f32 accumulation => relax tolerance vs the pure-f32 reference.
    assert jnp.allclose(out, ref, rtol=2e-2, atol=2e-2), "mismatch vs pure-JAX reference"

    print("KERNEL_OK")
</pallas_src>

<mosaic_0001>
module attributes {stable_mosaic.version = 11 : i64} {
  func.func @_hygcn_kernel(%arg0: i32, %arg1: memref<8x512xbf16, #tpu.memory_space<vmem>>, %arg2: memref<512x512xbf16, #tpu.memory_space<vmem>>, %arg3: memref<1x512xf32, #tpu.memory_space<vmem>>, %arg4: memref<8x512xf32, #tpu.memory_space<vmem>>) attributes {dimension_semantics = [#tpu.dimension_semantics<parallel>], iteration_bounds = array<i64: 1>, scalar_prefetch = 0 : i64, scratch_operands = 0 : i64, tpu.core_type = #tpu.core_type<tc>, window_params = [{transform_indices = @transform_0, window_bounds = array<i64: 8, 512>}, {pipeline_mode = #tpu.pipeline_mode<synchronous>, transform_indices = @transform_1, window_bounds = array<i64: 512, 512>}, {pipeline_mode = #tpu.pipeline_mode<synchronous>, transform_indices = @transform_2, window_bounds = array<i64: 1, 512>}, {transform_indices = @transform_3, window_bounds = array<i64: 8, 512>}]} {
    %c0 = arith.constant 0 : index
    %c0_0 = arith.constant 0 : index
    %0 = vector.load %arg1[%c0, %c0_0] : memref<8x512xbf16, #tpu.memory_space<vmem>>, vector<8x512xbf16>
    %c0_1 = arith.constant 0 : index
    %c0_2 = arith.constant 0 : index
    %1 = vector.load %arg2[%c0_1, %c0_2] : memref<512x512xbf16, #tpu.memory_space<vmem>>, vector<512x512xbf16>
    %cst = arith.constant dense<0.000000e+00> : vector<8x512xf32>
    %2 = tpu.matmul %0, %1, %cst {dimension_numbers = #tpu.dot_dimension_numbers<[1], [0], [0], [1], [0, 0, 1, 1], [], []>} : vector<8x512xbf16>, vector<512x512xbf16>, vector<8x512xf32> -> vector<8x512xf32>
    %c0_3 = arith.constant 0 : index
    %c0_4 = arith.constant 0 : index
    %3 = vector.load %arg3[%c0_3, %c0_4] : memref<1x512xf32, #tpu.memory_space<vmem>>, vector<1x512xf32>
    %4 = vector.broadcast %3 : vector<1x512xf32> to vector<8x512xf32>
    %5 = arith.addf %2, %4 : vector<8x512xf32>
    %cst_5 = arith.constant 0.000000e+00 : f32
    %6 = vector.broadcast %cst_5 : f32 to vector<8x512xf32>
    %7 = arith.maximumf %5, %6 : vector<8x512xf32>
    %c0_6 = arith.constant 0 : index
    %c0_7 = arith.constant 0 : index
    %8 = vector.load %arg4[%c0_6, %c0_7] : memref<8x512xf32, #tpu.memory_space<vmem>>, vector<8x512xf32>
    tpu.vector_store %arg4[%c0_6, %c0_7], %7 {strides = array<i32>} : memref<8x512xf32, #tpu.memory_space<vmem>>, vector<8x512xf32>,
    return
  }
  func.func @transform_0(%arg0: i32) -> (i32, i32) {
    %c0_i32 = arith.constant 0 : i32
    %c0_i32_0 = arith.constant 0 : i32
    return %arg0, %c0_i32 : i32, i32
  }
  func.func @transform_1(%arg0: i32) -> (i32, i32) {
    %c0_i32 = arith.constant 0 : i32
    %c0_i32_0 = arith.constant 0 : i32
    %c0_i32_1 = arith.constant 0 : i32
    return %c0_i32, %c0_i32_0 : i32, i32
  }
  func.func @transform_2(%arg0: i32) -> (i32, i32) {
    %c0_i32 = arith.constant 0 : i32
    %c0_i32_0 = arith.constant 0 : i32
    %c0_i32_1 = arith.constant 0 : i32
    return %c0_i32, %c0_i32_0 : i32, i32
  }
  func.func @transform_3(%arg0: i32) -> (i32, i32) {
    %c0_i32 = arith.constant 0 : i32
    %c0_i32_0 = arith.constant 0 : i32
    return %arg0, %c0_i32 : i32, i32
  }
}

</mosaic_0001>

<bundles_post_ra>
// kernel: tpu_custom_call.1
= control target key start
LH: loop header
LB: loop body
LE: loop exit
PB: predicated region body
PF: predicated region fallthrough
CT: control target
= control target key end

     0   :  { %8 = vsyncpa [#allocation3], 0  ;;  %s1896_s0 = inlined_call_operand.hbm [shape: bf16[8,512], index: 0, kind: input, shape index: {}]   ;;  %s1897_s1 = inlined_call_operand.hbm [shape: bf16[512,512], index: 1, kind: input, shape index: {}]   ;;  %s1898_s2 = inlined_call_operand.hbm [shape: f32[1,512], index: 2, kind: input, shape index: {}]   ;;  %s1899_s3 = inlined_call_operand.hbm [shape: f32[8,512], index: 3, kind: output, shape index: {}]  }
   0x1   :  { %9 = vsyncpa [#allocation6], 0  ;;  %s26_s14 = sshll.u32 %s1897_s1, 4  ;;  %s27_s14 = int_to_ptr.hbm [resolvable:$true] %s26_s14 }
   0x2   :  { %10 = vsyncpa [#allocation4], 0  ;;  %s1834_s15 = smov [#allocation5]   ;;  %s16_s19 = sshll.u32 %s1896_s0, 4  ;;  %s17_s19 = int_to_ptr.hbm [resolvable:$true] %s16_s19 }
   0x3   :  { %s28_s16 = sshll.u32 %s1834_s15, 4  ;;  %s1835_s20 = smov 256   ;;  %s29_s16 = int_to_ptr.vmem [resolvable:$true] %s28_s16 }
   0x4   :  { %s1836_s21 = smov 16   ;;  %s1837_s22 = smov [#allocation2]  }
   0x5   :  { %34 = dma.hbm_to_vmem [thread:$0]  %s27_s14, 16384, %s29_s16, [#allocation6], %s1835_s20, %s1835_s20, %s1836_s21  }
   0x6   :  { %s18_s23 = sshll.u32 %s1837_s22, 4  ;;  %s40_s26 = sshll.u32 %s1898_s2, 4  ;;  %s19_s23 = int_to_ptr.vmem [resolvable:$true] %s18_s23  ;;  %s41_s26 = int_to_ptr.hbm [resolvable:$true] %s40_s26 }
   0x7   :  { %21 = dma.hbm_to_vmem [thread:$0]  %s17_s19, 256, %s19_s23, [#allocation3]  }
   0x8   :  { %s1838_s1 = smov [#allocation7]  }
   0x9   :  { %s42_s27 = sshll.u32 %s1838_s1, 4  ;;  %s43_s27 = int_to_ptr.vmem [resolvable:$true] %s42_s27 }
   0xa   :  { %45 = dma.hbm_to_vmem [thread:$0]  %s41_s26, 64, %s43_s27, [#allocation6]  }
   0xb   :  { %1828 = dma.done.wait [#allocation3], 256  }
   0xc   :  { %1829 = vsyncadd [#allocation3], 4294967040 }
   0xd   :  { %1830 = dma.done.wait [#allocation6], 16448  }
   0xe   :  { %1831 = vsyncadd [#allocation6], 4294950848  ;;  %v1200_v0 = vld [vmem:[#allocation5 + $0xe0] sm:$0xf]  ;;  %v1628_v1 = vld [vmem:[#allocation5 + $0xec] sm:$0xf0] }
   0xf   :  { %v1328_v2 = vld [vmem:[#allocation5 + $0x1e0] sm:$0xf]  ;;  %v1201_v3 = vor.u32 %v1628_v1, %v1200_v0  ;;  %v1660_v4 = vld [vmem:[#allocation5 + $0x1ec] sm:$0xf0]  ;;  %s1839_s0 = smov [#allocation8]   ;;  %s1075_s30 = sshll.u32 %s1899_s3, 4  ;;  %s1076_s30 = int_to_ptr.hbm [resolvable:$true] %s1075_s30 }
  0x10   :  { %v1456_v5 = vld [vmem:[#allocation5 + $0x2e0] sm:$0xf]  ;;  %v1692_v6 = vld [vmem:[#allocation5 + $0x2ec] sm:$0xf0]  ;;  %v1329_v7 = vor.u32 %v1660_v4, %v1328_v2  ;;  %s1073_s2 = sshll.u32 %s1839_s0, 4  ;;  %s1074_s2 = int_to_ptr.vmem [resolvable:$true] %s1073_s2 }
  0x11   :  { %v1457_v8 = vor.u32 %v1692_v6, %v1456_v5  ;;  %v1584_v9 = vld [vmem:[#allocation5 + $0x3e0] sm:$0xf]  ;;  %v1724_v10 = vld [vmem:[#allocation5 + $0x3ec] sm:$0xf0]  ;;  %852 = vmatpush.bf16.msra.mxu0 %v1201_v3 }
  0x12   :  { %v1184_v11 = vld [vmem:[#allocation5 + $0xc0] sm:$0xf]  ;;  %v1585_v12 = vor.u32 %v1724_v10, %v1584_v9  ;;  %v1624_v13 = vld [vmem:[#allocation5 + $0xcc] sm:$0xf0]  ;;  %865 = vmatpush.bf16.msra.mxu1 %v1329_v7 }
  0x13   :  { %v1312_v14 = vld [vmem:[#allocation5 + $0x1c0] sm:$0xf]  ;;  %v1656_v15 = vld [vmem:[#allocation5 + $0x1cc] sm:$0xf0]  ;;  %878 = vmatpush.bf16.msra.mxu2 %v1457_v8  ;;  %v1185_v16 = vor.u32 %v1624_v13, %v1184_v11 }
  0x14   :  { %v1313_v17 = vor.u32 %v1656_v15, %v1312_v14  ;;  %v1440_v18 = vld [vmem:[#allocation5 + $0x2c0] sm:$0xf]  ;;  %v1688_v19 = vld [vmem:[#allocation5 + $0x2cc] sm:$0xf0]  ;;  %891 = vmatpush.bf16.msra.mxu3 %v1585_v12 }
  0x15   :  { %v1568_v20 = vld [vmem:[#allocation5 + $0x3c0] sm:$0xf]  ;;  %v1441_v21 = vor.u32 %v1688_v19, %v1440_v18  ;;  %v1720_v22 = vld [vmem:[#allocation5 + $0x3cc] sm:$0xf0]  ;;  %853 = vmatpush.bf16.msra.mxu0 %v1185_v16 }
  0x16   :  { %v1168_v23 = vld [vmem:[#allocation5 + $0xa0] sm:$0xf]  ;;  %v1620_v24 = vld [vmem:[#allocation5 + $0xac] sm:$0xf0]  ;;  %v1569_v25 = vor.u32 %v1720_v22, %v1568_v20  ;;  %866 = vmatpush.bf16.msra.mxu1 %v1313_v17 }
  0x17   :  { %v1296_v26 = vld [vmem:[#allocation5 + $0x1a0] sm:$0xf]  ;;  %v1652_v27 = vld [vmem:[#allocation5 + $0x1ac] sm:$0xf0]  ;;  %v1169_v29 = vor.u32 %v1620_v24, %v1168_v23  ;;  %879 = vmatpush.bf16.msra.mxu2 %v1441_v21 }
  0x18   :  { %v1424_v28 = vld [vmem:[#allocation5 + $0x2a0] sm:$0xf]  ;;  %v1684_v30 = vld [vmem:[#allocation5 + $0x2ac] sm:$0xf0]  ;;  %v1297_v33 = vor.u32 %v1652_v27, %v1296_v26  ;;  %892 = vmatpush.bf16.msra.mxu3 %v1569_v25 }
  0x19   :  { %v1552_v31 = vld [vmem:[#allocation5 + $0x3a0] sm:$0xf]  ;;  %v1716_v32 = vld [vmem:[#allocation5 + $0x3ac] sm:$0xf0]  ;;  %v1425_v34 = vor.u32 %v1684_v30, %v1424_v28  ;;  %854 = vmatpush.bf16.msra.mxu0 %v1169_v29  ;;  %v1626_v28 = vld [vmem:[#allocation5 + $0xe4] sm:$0xf] }
  0x1a   :  { %v1152_v35 = vld [vmem:[#allocation5 + $0x80] sm:$0xf]  ;;  %v1616_v36 = vld [vmem:[#allocation5 + $0x8c] sm:$0xf0]  ;;  %v1553_v38 = vor.u32 %v1716_v32, %v1552_v31  ;;  %867 = vmatpush.bf16.msra.mxu1 %v1297_v33  ;;  %v1202_v29 = vld [vmem:[#allocation5 + $0xf0] sm:$0xf0] }
  0x1b   :  { %v1280_v37 = vld [vmem:[#allocation5 + $0x180] sm:$0xf]  ;;  %v1648_v39 = vld [vmem:[#allocation5 + $0x18c] sm:$0xf0]  ;;  %v1153_v44 = vor.u32 %v1616_v36, %v1152_v35  ;;  %880 = vmatpush.bf16.msra.mxu2 %v1425_v34  ;;  %v1658_v30 = vld [vmem:[#allocation5 + $0x1e4] sm:$0xf] }
  0x1c   :  { %v1408_v40 = vld [vmem:[#allocation5 + $0x280] sm:$0xf]  ;;  %v1680_v41 = vld [vmem:[#allocation5 + $0x28c] sm:$0xf0]  ;;  %v1281_v45 = vor.u32 %v1648_v39, %v1280_v37  ;;  %893 = vmatpush.bf16.msra.mxu3 %v1553_v38  ;;  %v1330_v32 = vld [vmem:[#allocation5 + $0x1f0] sm:$0xf0] }
  0x1d   :  { %v1536_v42 = vld [vmem:[#allocation5 + $0x380] sm:$0xf]  ;;  %v1712_v43 = vld [vmem:[#allocation5 + $0x38c] sm:$0xf0]  ;;  %v1409_v46 = vor.u32 %v1680_v41, %v1408_v40  ;;  %855 = vmatpush.bf16.msra.mxu0 %v1153_v44  ;;  %v1690_v33 = vld [vmem:[#allocation5 + $0x2e4] sm:$0xf]  ;;  %v1205_v40 = vor.u32 %v1626_v28, %v1202_v29  ;;  %v1333_v41 = vor.u32 %v1658_v30, %v1330_v32 }
  0x1e   :  { %v1136_v47 = vld [vmem:[#allocation5 + $0x60] sm:$0xf]  ;;  %v1612_v48 = vld [vmem:[#allocation5 + $0x6c] sm:$0xf0]  ;;  %v1537_v50 = vor.u32 %v1712_v43, %v1536_v42  ;;  %868 = vmatpush.bf16.msra.mxu1 %v1281_v45  ;;  %v1458_v34 = vld [vmem:[#allocation5 + $0x2f0] sm:$0xf0] }
  0x1f   :  { %v1264_v49 = vld [vmem:[#allocation5 + $0x160] sm:$0xf]  ;;  %v1644_v51 = vld [vmem:[#allocation5 + $0x16c] sm:$0xf0]  ;;  %v1137_v56 = vor.u32 %v1612_v48, %v1136_v47  ;;  %881 = vmatpush.bf16.msra.mxu2 %v1409_v46  ;;  %v1722_v37 = vld [vmem:[#allocation5 + $0x3e4] sm:$0xf]  ;;  %v1461_v42 = vor.u32 %v1690_v33, %v1458_v34 }
  0x20   :  { %v1392_v52 = vld [vmem:[#allocation5 + $0x260] sm:$0xf]  ;;  %v1676_v53 = vld [vmem:[#allocation5 + $0x26c] sm:$0xf0]  ;;  %v1265_v57 = vor.u32 %v1644_v51, %v1264_v49  ;;  %894 = vmatpush.bf16.msra.mxu3 %v1537_v50  ;;  %v1586_v38 = vld [vmem:[#allocation5 + $0x3f0] sm:$0xf0] }
  0x21   :  { %v1520_v54 = vld [vmem:[#allocation5 + $0x360] sm:$0xf]  ;;  %v1708_v55 = vld [vmem:[#allocation5 + $0x36c] sm:$0xf0]  ;;  %v1393_v58 = vor.u32 %v1676_v53, %v1392_v52  ;;  %856 = vmatpush.bf16.msra.mxu0 %v1137_v56  ;;  %v1622_v43 = vld [vmem:[#allocation5 + $0xc4] sm:$0xf]  ;;  %v1589_v46 = vor.u32 %v1722_v37, %v1586_v38 }
  0x22   :  { %v1120_v59 = vld [vmem:[#allocation5 + $0x40] sm:$0xf]  ;;  %v1608_v60 = vld [vmem:[#allocation5 + $0x4c] sm:$0xf0]  ;;  %v1521_v62 = vor.u32 %v1708_v55, %v1520_v54  ;;  %869 = vmatpush.bf16.msra.mxu1 %v1265_v57  ;;  %v1186_v44 = vld [vmem:[#allocation5 + $0xd0] sm:$0xf0] }
  0x23   :  { %v1248_v61 = vld [vmem:[#allocation5 + $0x140] sm:$0xf]  ;;  %v1640_v63 = vld [vmem:[#allocation5 + $0x14c] sm:$0xf0]  ;;  %v1121_v4 = vor.u32 %v1608_v60, %v1120_v59  ;;  %882 = vmatpush.bf16.msra.mxu2 %v1393_v58  ;;  %v1654_v45 = vld [vmem:[#allocation5 + $0x1c4] sm:$0xf]  ;;  %v1189_v52 = vor.u32 %v1622_v43, %v1186_v44 }
  0x24   :  { %v1376_v0 = vld [vmem:[#allocation5 + $0x240] sm:$0xf]  ;;  %v1672_v1 = vld [vmem:[#allocation5 + $0x24c] sm:$0xf0]  ;;  %v1249_v5 = vor.u32 %v1640_v63, %v1248_v61  ;;  %895 = vmatpush.bf16.msra.mxu3 %v1521_v62  ;;  %v1314_v47 = vld [vmem:[#allocation5 + $0x1d0] sm:$0xf0] }
  0x25   :  { %v1504_v2 = vld [vmem:[#allocation5 + $0x340] sm:$0xf]  ;;  %v1704_v3 = vld [vmem:[#allocation5 + $0x34c] sm:$0xf0]  ;;  %v1377_v6 = vor.u32 %v1672_v1, %v1376_v0  ;;  %857 = vmatpush.bf16.msra.mxu0 %v1121_v4  ;;  %v1686_v48 = vld [vmem:[#allocation5 + $0x2c4] sm:$0xf]  ;;  %v1317_v54 = vor.u32 %v1654_v45, %v1314_v47 }
  0x26   :  { %v1104_v7 = vld [vmem:[#allocation5 + $0x20] sm:$0xf]  ;;  %v1604_v8 = vld [vmem:[#allocation5 + $0x2c] sm:$0xf0]  ;;  %v1505_v10 = vor.u32 %v1704_v3, %v1504_v2  ;;  %870 = vmatpush.bf16.msra.mxu1 %v1249_v5  ;;  %v1442_v49 = vld [vmem:[#allocation5 + $0x2d0] sm:$0xf0] }
  0x27   :  { %v1232_v9 = vld [vmem:[#allocation5 + $0x120] sm:$0xf]  ;;  %v1636_v11 = vld [vmem:[#allocation5 + $0x12c] sm:$0xf0]  ;;  %v1105_v16 = vor.u32 %v1604_v8, %v1104_v7  ;;  %883 = vmatpush.bf16.msra.mxu2 %v1377_v6  ;;  %v1718_v50 = vld [vmem:[#allocation5 + $0x3c4] sm:$0xf]  ;;  %v1445_v55 = vor.u32 %v1686_v48, %v1442_v49 }
  0x28   :  { %v1360_v12 = vld [vmem:[#allocation5 + $0x220] sm:$0xf]  ;;  %v1668_v13 = vld [vmem:[#allocation5 + $0x22c] sm:$0xf0]  ;;  %v1233_v19 = vor.u32 %v1636_v11, %v1232_v9  ;;  %896 = vmatpush.bf16.msra.mxu3 %v1505_v10  ;;  %v1570_v51 = vld [vmem:[#allocation5 + $0x3d0] sm:$0xf0] }
  0x29   :  { %v1488_v14 = vld [vmem:[#allocation5 + $0x320] sm:$0xf]  ;;  %v1700_v15 = vld [vmem:[#allocation5 + $0x32c] sm:$0xf0]  ;;  %v1361_v20 = vor.u32 %v1668_v13, %v1360_v12  ;;  %858 = vmatpush.bf16.msra.mxu0 %v1105_v16  ;;  %v1618_v53 = vld [vmem:[#allocation5 + $0xa4] sm:$0xf]  ;;  %v1573_v59 = vor.u32 %v1718_v50, %v1570_v51 }
  0x2a   :  { %v1088_v17 = vld [vmem:[#allocation5] sm:$0xf]  ;;  %v1600_v18 = vld [vmem:[#allocation5 + $0xc] sm:$0xf0]  ;;  %v1489_v24 = vor.u32 %v1700_v15, %v1488_v14  ;;  %871 = vmatpush.bf16.msra.mxu1 %v1233_v19  ;;  %v1170_v56 = vld [vmem:[#allocation5 + $0xb0] sm:$0xf0] }
  0x2b   :  { %v1216_v21 = vld [vmem:[#allocation5 + $0x100] sm:$0xf]  ;;  %v1632_v22 = vld [vmem:[#allocation5 + $0x10c] sm:$0xf0]  ;;  %v1089_v31 = vor.u32 %v1600_v18, %v1088_v17  ;;  %884 = vmatpush.bf16.msra.mxu2 %v1361_v20  ;;  %v1650_v57 = vld [vmem:[#allocation5 + $0x1a4] sm:$0xf]  ;;  %v1173_v0 = vor.u32 %v1618_v53, %v1170_v56 }
  0x2c   :  { %v1344_v23 = vld [vmem:[#allocation5 + $0x200] sm:$0xf]  ;;  %v1664_v25 = vld [vmem:[#allocation5 + $0x20c] sm:$0xf0]  ;;  %v1217_v35 = vor.u32 %v1632_v22, %v1216_v21  ;;  %897 = vmatpush.bf16.msra.mxu3 %v1489_v24  ;;  %v1298_v58 = vld [vmem:[#allocation5 + $0x1b0] sm:$0xf0] }
  0x2d   :  { %v1472_v26 = vld [vmem:[#allocation5 + $0x300] sm:$0xf]  ;;  %v1696_v27 = vld [vmem:[#allocation5 + $0x30c] sm:$0xf0]  ;;  %v1345_v36 = vor.u32 %v1664_v25, %v1344_v23  ;;  %859 = vmatpush.bf16.msra.mxu0 %v1089_v31  ;;  %v1682_v60 = vld [vmem:[#allocation5 + $0x2a4] sm:$0xf]  ;;  %v1301_v1 = vor.u32 %v1650_v57, %v1298_v58 }
  0x2e   :  { %v1473_v39 = vor.u32 %v1696_v27, %v1472_v26  ;;  %872 = vmatpush.bf16.msra.mxu1 %v1217_v35  ;;  %v1426_v61 = vld [vmem:[#allocation5 + $0x2b0] sm:$0xf0]  ;;  %v1714_v62 = vld [vmem:[#allocation5 + $0x3a4] sm:$0xf]  ;;  %v59_v2 = vld [vmem:[#allocation2 + $0x8] sm:$0xff] }
  0x2f   :  { %885 = vmatpush.bf16.msra.mxu2 %v1345_v36  ;;  %v1554_v63 = vld [vmem:[#allocation5 + $0x3b0] sm:$0xf0]  ;;  %v1429_v4 = vor.u32 %v1682_v60, %v1426_v61  ;;  %v1614_v5 = vld [vmem:[#allocation5 + $0x84] sm:$0xf]  ;;  %v202_v8 = vunpack.c.l.b16 %v59_v2  ;;  %v203_v9 = vunpack.c.h.b16 %v59_v2 }
  0x30   :  { %898 = vmatpush.bf16.msra.mxu3 %v1473_v39  ;;  %v58_v3 = vld [vmem:[#allocation2] sm:$0xff]  ;;  %v1646_v7 = vld [vmem:[#allocation5 + $0x184] sm:$0xf]  ;;  %v1557_v11 = vor.u32 %v1714_v62, %v1554_v63 }
  0x31   :  { %904 = vmatpush.bf16.msrb.mxu0 %v1205_v40  ;;  %v1154_v6 = vld [vmem:[#allocation5 + $0x90] sm:$0xf0]  ;;  %v200_v10 = vunpack.c.l.b16 %v58_v3  ;;  %v1678_v13 = vld [vmem:[#allocation5 + $0x284] sm:$0xf]  ;;  %v201_v15 = vunpack.c.h.b16 %v58_v3  ;;  %v1869_v18 = vpack.c.b16 %v202_v8, %v202_v8  ;;  %v1871_v19 = vpack.c.b16 %v203_v9, %v203_v9  ;;  %v1336_v8 = vld [vmem:[#allocation5 + $0x1e8] sm:$0xf] }
  0x32   :  { %917 = vmatpush.bf16.msrb.mxu1 %v1333_v41  ;;  %v1282_v12 = vld [vmem:[#allocation5 + $0x190] sm:$0xf0]  ;;  %v1710_v16 = vld [vmem:[#allocation5 + $0x384] sm:$0xf]  ;;  %v1157_v21 = vor.u32 %v1614_v5, %v1154_v6  ;;  %v1208_v6 = vld [vmem:[#allocation5 + $0xe8] sm:$0xf] }
  0x33   :  { %930 = vmatpush.bf16.msrb.mxu2 %v1461_v42  ;;  %v1410_v14 = vld [vmem:[#allocation5 + $0x290] sm:$0xf0]  ;;  %v1873_v20 = vpack.c.b16 %v200_v10, %v200_v10  ;;  %v1875_v22 = vpack.c.b16 %v201_v15, %v201_v15  ;;  %v1285_v23 = vor.u32 %v1646_v7, %v1282_v12  ;;  %v1610_v25 = vld [vmem:[#allocation5 + $0x64] sm:$0xf]  ;;  %899 = vmatmul.bf16.vlgmr.msra.gmra.mxu3 %v1871_v19  ;;  %v1629_v7 = vld [vmem:[#allocation5 + $0xf4] sm:$0xf0] }
  0x34   :  { %943 = vmatpush.bf16.msrb.mxu3 %v1589_v46  ;;  %v1538_v17 = vld [vmem:[#allocation5 + $0x390] sm:$0xf0]  ;;  %v1413_v24 = vor.u32 %v1678_v13, %v1410_v14  ;;  %v1642_v27 = vld [vmem:[#allocation5 + $0x164] sm:$0xf]  ;;  %886 = vmatmul.bf16.vlgmr.msra.gmra.mxu2 %v1869_v18  ;;  %v1661_v10 = vld [vmem:[#allocation5 + $0x1f4] sm:$0xf0] }
  0x35   :  { %905 = vmatpush.bf16.msrb.mxu0 %v1189_v52  ;;  %v1138_v26 = vld [vmem:[#allocation5 + $0x70] sm:$0xf0]  ;;  %v1541_v28 = vor.u32 %v1710_v16, %v1538_v17  ;;  %v1674_v30 = vld [vmem:[#allocation5 + $0x264] sm:$0xf]  ;;  %873 = vmatmul.bf16.vlgmr.msra.gmra.mxu1 %v1875_v22  ;;  %v1693_v12 = vld [vmem:[#allocation5 + $0x2f4] sm:$0xf0] }
  0x36   :  { %918 = vmatpush.bf16.msrb.mxu1 %v1317_v54  ;;  %v1266_v29 = vld [vmem:[#allocation5 + $0x170] sm:$0xf0]  ;;  %v1706_v32 = vld [vmem:[#allocation5 + $0x364] sm:$0xf]  ;;  %860 = vmatmul.bf16.vlgmr.msra.gmra.mxu0 %v1873_v20  ;;  %v1141_v34 = vor.u32 %v1610_v25, %v1138_v26  ;;  %v1592_v15 = vld [vmem:[#allocation5 + $0x3e8] sm:$0xf] }
  0x37   :  { %931 = vmatpush.bf16.msrb.mxu2 %v1445_v55  ;;  %v1394_v31 = vld [vmem:[#allocation5 + $0x270] sm:$0xf0]  ;;  %v1269_v35 = vor.u32 %v1642_v27, %v1266_v29  ;;  %v1606_v37 = vld [vmem:[#allocation5 + $0x44] sm:$0xf]  ;;  %v1725_v16 = vld [vmem:[#allocation5 + $0x3f4] sm:$0xf0] }
  0x38   :  { %944 = vmatpush.bf16.msrb.mxu3 %v1573_v59  ;;  %v1522_v33 = vld [vmem:[#allocation5 + $0x370] sm:$0xf0]  ;;  %v1397_v36 = vor.u32 %v1674_v30, %v1394_v31  ;;  %v1638_v39 = vld [vmem:[#allocation5 + $0x144] sm:$0xf]  ;;  %v1192_v25 = vld [vmem:[#allocation5 + $0xc8] sm:$0xf] }
  0x39   :  { %906 = vmatpush.bf16.msrb.mxu0 %v1173_v0  ;;  %v1122_v38 = vld [vmem:[#allocation5 + $0x50] sm:$0xf0]  ;;  %v1525_v40 = vor.u32 %v1706_v32, %v1522_v33  ;;  %v1670_v42 = vld [vmem:[#allocation5 + $0x244] sm:$0xf]  ;;  %v1625_v26 = vld [vmem:[#allocation5 + $0xd4] sm:$0xf0] }
  0x3a   :  { %919 = vmatpush.bf16.msrb.mxu1 %v1301_v1  ;;  %v1250_v41 = vld [vmem:[#allocation5 + $0x150] sm:$0xf0]  ;;  %v1702_v44 = vld [vmem:[#allocation5 + $0x344] sm:$0xf]  ;;  %v1125_v46 = vor.u32 %v1606_v37, %v1122_v38  ;;  %v1320_v27 = vld [vmem:[#allocation5 + $0x1c8] sm:$0xf] }
  0x3b   :  { %932 = vmatpush.bf16.msrb.mxu2 %v1429_v4  ;;  %v1378_v43 = vld [vmem:[#allocation5 + $0x250] sm:$0xf0]  ;;  %v1253_v47 = vor.u32 %v1638_v39, %v1250_v41  ;;  %v1602_v49 = vld [vmem:[#allocation5 + $0x24] sm:$0xf]  ;;  %v1657_v29 = vld [vmem:[#allocation5 + $0x1d4] sm:$0xf0] }
  0x3c   :  { %945 = vmatpush.bf16.msrb.mxu3 %v1557_v11  ;;  %v1506_v45 = vld [vmem:[#allocation5 + $0x350] sm:$0xf0]  ;;  %v1381_v48 = vor.u32 %v1670_v42, %v1378_v43  ;;  %v1634_v51 = vld [vmem:[#allocation5 + $0x124] sm:$0xf]  ;;  %v1464_v11 = vld [vmem:[#allocation5 + $0x2e8] sm:$0xf] }
  0x3d   :  { %907 = vmatpush.bf16.msrb.mxu0 %v1157_v21  ;;  %v1106_v50 = vld [vmem:[#allocation5 + $0x30] sm:$0xf0]  ;;  %v1509_v52 = vor.u32 %v1702_v44, %v1506_v45  ;;  %v1666_v54 = vld [vmem:[#allocation5 + $0x224] sm:$0xf]  ;;  %v1209_v21 = vor.u32 %v1629_v7, %v1208_v6  ;;  %v1448_v30 = vld [vmem:[#allocation5 + $0x2c8] sm:$0xf] }
  0x3e   :  { %920 = vmatpush.bf16.msrb.mxu1 %v1285_v23  ;;  %v1234_v53 = vld [vmem:[#allocation5 + $0x130] sm:$0xf0]  ;;  %v1698_v56 = vld [vmem:[#allocation5 + $0x324] sm:$0xf]  ;;  %v1109_v58 = vor.u32 %v1602_v49, %v1106_v50  ;;  %v1337_v23 = vor.u32 %v1661_v10, %v1336_v8  ;;  %v1689_v31 = vld [vmem:[#allocation5 + $0x2d4] sm:$0xf0] }
  0x3f   :  { %933 = vmatpush.bf16.msrb.mxu2 %v1413_v24  ;;  %v1362_v55 = vld [vmem:[#allocation5 + $0x230] sm:$0xf0]  ;;  %v1598_v59 = vld [vmem:[#allocation5 + $0x4] sm:$0xf]  ;;  %v1237_v61 = vor.u32 %v1634_v51, %v1234_v53  ;;  %v1465_v24 = vor.u32 %v1693_v12, %v1464_v11  ;;  %v1576_v32 = vld [vmem:[#allocation5 + $0x3c8] sm:$0xf] }
  0x40   :  { %946 = vmatpush.bf16.msrb.mxu3 %v1541_v28  ;;  %v1490_v57 = vld [vmem:[#allocation5 + $0x330] sm:$0xf0]  ;;  %v1365_v62 = vor.u32 %v1666_v54, %v1362_v55  ;;  %v1630_v63 = vld [vmem:[#allocation5 + $0x104] sm:$0xf]  ;;  %v1593_v28 = vor.u32 %v1725_v16, %v1592_v15  ;;  %v1721_v33 = vld [vmem:[#allocation5 + $0x3d4] sm:$0xf0] }
  0x41   :  { %908 = vmatpush.bf16.msrb.mxu0 %v1141_v34  ;;  %v1090_v60 = vld [vmem:[#allocation5 + $0x10] sm:$0xf0]  ;;  %v1662_v1 = vld [vmem:[#allocation5 + $0x204] sm:$0xf]  ;;  %v1493_v2 = vor.u32 %v1698_v56, %v1490_v57  ;;  %v1193_v34 = vor.u32 %v1625_v26, %v1192_v25  ;;  %v1176_v37 = vld [vmem:[#allocation5 + $0xa8] sm:$0xf] }
  0x42   :  { %921 = vmatpush.bf16.msrb.mxu1 %v1269_v35  ;;  %v1218_v0 = vld [vmem:[#allocation5 + $0x110] sm:$0xf0]  ;;  %v1694_v4 = vld [vmem:[#allocation5 + $0x304] sm:$0xf]  ;;  %v1093_v9 = vor.u32 %v1598_v59, %v1090_v60  ;;  %v1321_v35 = vor.u32 %v1657_v29, %v1320_v27  ;;  %v1621_v38 = vld [vmem:[#allocation5 + $0xb4] sm:$0xf0] }
  0x43   :  { %934 = vmatpush.bf16.msrb.mxu2 %v1397_v36  ;;  %v1346_v3 = vld [vmem:[#allocation5 + $0x210] sm:$0xf0]  ;;  %v1221_v13 = vor.u32 %v1630_v63, %v1218_v0  ;;  %v1449_v36 = vor.u32 %v1689_v31, %v1448_v30  ;;  %v1304_v39 = vld [vmem:[#allocation5 + $0x1a8] sm:$0xf]  ;;  %v1653_v41 = vld [vmem:[#allocation5 + $0x1b4] sm:$0xf0] }
  0x44   :  { %947 = vmatpush.bf16.msrb.mxu3 %v1525_v40  ;;  %v1474_v5 = vld [vmem:[#allocation5 + $0x310] sm:$0xf0]  ;;  %v1349_v14 = vor.u32 %v1662_v1, %v1346_v3  ;;  %v1577_v40 = vor.u32 %v1721_v33, %v1576_v32  ;;  %v1432_v42 = vld [vmem:[#allocation5 + $0x2a8] sm:$0xf]  ;;  %v1685_v43 = vld [vmem:[#allocation5 + $0x2b4] sm:$0xf0] }
  0x45   :  { %909 = vmatpush.bf16.msrb.mxu0 %v1125_v46  ;;  %v1477_v17 = vor.u32 %v1694_v4, %v1474_v5  ;;  %v1560_v44 = vld [vmem:[#allocation5 + $0x3a8] sm:$0xf]  ;;  %v1717_v45 = vld [vmem:[#allocation5 + $0x3b4] sm:$0xf0]  ;;  %v1177_v46 = vor.u32 %v1621_v38, %v1176_v37 }
  0x46   :  { %922 = vmatpush.bf16.msrb.mxu1 %v1253_v47  ;;  %v1305_v47 = vor.u32 %v1653_v41, %v1304_v39  ;;  %v1160_v49 = vld [vmem:[#allocation5 + $0x88] sm:$0xf]  ;;  %v1617_v50 = vld [vmem:[#allocation5 + $0x94] sm:$0xf0] }
  0x47   :  { %935 = vmatpush.bf16.msrb.mxu2 %v1381_v48  ;;  %v1433_v48 = vor.u32 %v1685_v43, %v1432_v42  ;;  %v1288_v51 = vld [vmem:[#allocation5 + $0x188] sm:$0xf]  ;;  %v1649_v53 = vld [vmem:[#allocation5 + $0x194] sm:$0xf0] }
  0x48   :  { %948 = vmatpush.bf16.msrb.mxu3 %v1509_v52  ;;  %v1561_v52 = vor.u32 %v1717_v45, %v1560_v44  ;;  %v1416_v54 = vld [vmem:[#allocation5 + $0x288] sm:$0xf]  ;;  %v1681_v55 = vld [vmem:[#allocation5 + $0x294] sm:$0xf0]  ;;  %v1289_v59 = vor.u32 %v1649_v53, %v1288_v51  ;;  %v1691_v51 = vld [vmem:[#allocation5 + $0x2ec] sm:$0xf] }
  0x49   :  { %910 = vmatpush.bf16.msrb.mxu0 %v1109_v58  ;;  %v1544_v56 = vld [vmem:[#allocation5 + $0x388] sm:$0xf]  ;;  %v1713_v57 = vld [vmem:[#allocation5 + $0x394] sm:$0xf0]  ;;  %v1161_v58 = vor.u32 %v1617_v50, %v1160_v49  ;;  %v1417_v60 = vor.u32 %v1681_v55, %v1416_v54  ;;  %v1338_v50 = vld [vmem:[#allocation5 + $0x1f8] sm:$0xf0] }
  0x4a   :  { %923 = vmatpush.bf16.msrb.mxu1 %v1237_v61  ;;  %v1144_v61 = vld [vmem:[#allocation5 + $0x68] sm:$0xf]  ;;  %v1545_v0 = vor.u32 %v1713_v57, %v1544_v56  ;;  %v1645_v1 = vld [vmem:[#allocation5 + $0x174] sm:$0xf0]  ;;  %v1723_v55 = vld [vmem:[#allocation5 + $0x3ec] sm:$0xf] }
  0x4b   :  { %936 = vmatpush.bf16.msrb.mxu2 %v1365_v62  ;;  %v1613_v62 = vld [vmem:[#allocation5 + $0x74] sm:$0xf0]  ;;  %v1272_v63 = vld [vmem:[#allocation5 + $0x168] sm:$0xf]  ;;  %v1594_v56 = vld [vmem:[#allocation5 + $0x3f8] sm:$0xf0] }
  0x4c   :  { %949 = vmatpush.bf16.msrb.mxu3 %v1493_v2  ;;  %v1400_v2 = vld [vmem:[#allocation5 + $0x268] sm:$0xf]  ;;  %v1677_v3 = vld [vmem:[#allocation5 + $0x274] sm:$0xf0]  ;;  %v1145_v6 = vor.u32 %v1613_v62, %v1144_v61  ;;  %v1273_v7 = vor.u32 %v1645_v1, %v1272_v63  ;;  %v1623_v61 = vld [vmem:[#allocation5 + $0xcc] sm:$0xf] }
  0x4d   :  { %911 = vmatpush.bf16.msrb.mxu0 %v1093_v9  ;;  %v1528_v4 = vld [vmem:[#allocation5 + $0x368] sm:$0xf]  ;;  %v1709_v5 = vld [vmem:[#allocation5 + $0x374] sm:$0xf0]  ;;  %v1401_v8 = vor.u32 %v1677_v3, %v1400_v2  ;;  %v1194_v62 = vld [vmem:[#allocation5 + $0xd8] sm:$0xf0] }
  0x4e   :  { %924 = vmatpush.bf16.msrb.mxu1 %v1221_v13  ;;  %v1128_v9 = vld [vmem:[#allocation5 + $0x48] sm:$0xf]  ;;  %v1609_v10 = vld [vmem:[#allocation5 + $0x54] sm:$0xf0]  ;;  %v1529_v12 = vor.u32 %v1709_v5, %v1528_v4  ;;  %v1655_v63 = vld [vmem:[#allocation5 + $0x1cc] sm:$0xf] }
  0x4f   :  { %937 = vmatpush.bf16.msrb.mxu2 %v1349_v14  ;;  %v1256_v11 = vld [vmem:[#allocation5 + $0x148] sm:$0xf]  ;;  %v1641_v13 = vld [vmem:[#allocation5 + $0x154] sm:$0xf0]  ;;  %v1322_v1 = vld [vmem:[#allocation5 + $0x1d8] sm:$0xf0] }
  0x50   :  { %950 = vmatpush.bf16.msrb.mxu3 %v1477_v17  ;;  %912 = vmatmul.bf16.vlgmr.msrb.gmra.mxu0 %v1873_v20  ;;  %v1384_v14 = vld [vmem:[#allocation5 + $0x248] sm:$0xf]  ;;  %v1673_v15 = vld [vmem:[#allocation5 + $0x254] sm:$0xf0]  ;;  %v1687_v2 = vld [vmem:[#allocation5 + $0x2cc] sm:$0xf] }
  0x51   :  { %956 = vmatpush.bf16.msra.mxu0 %v1209_v21  ;;  %925 = vmatmul.bf16.vlgmr.msrb.gmra.mxu1 %v1875_v22  ;;  %v1512_v16 = vld [vmem:[#allocation5 + $0x348] sm:$0xf]  ;;  %v1705_v17 = vld [vmem:[#allocation5 + $0x354] sm:$0xf0]  ;;  %v1129_v21 = vor.u32 %v1609_v10, %v1128_v9  ;;  %v1450_v3 = vld [vmem:[#allocation5 + $0x2d8] sm:$0xf0] }
  0x52   :  { %969 = vmatpush.bf16.msra.mxu1 %v1337_v23  ;;  %938 = vmatmul.bf16.vlgmr.msrb.gmra.mxu2 %v1869_v18  ;;  %v1257_v23 = vor.u32 %v1641_v13, %v1256_v11  ;;  %v1112_v25 = vld [vmem:[#allocation5 + $0x28] sm:$0xf]  ;;  %v1605_v26 = vld [vmem:[#allocation5 + $0x34] sm:$0xf0]  ;;  %v1719_v4 = vld [vmem:[#allocation5 + $0x3cc] sm:$0xf] }
  0x53   :  { %982 = vmatpush.bf16.msra.mxu2 %v1465_v24  ;;  %951 = vmatmul.bf16.vlgmr.msrb.gmra.mxu3 %v1871_v19  ;;  %v1385_v24 = vor.u32 %v1673_v15, %v1384_v14  ;;  %v1240_v27 = vld [vmem:[#allocation5 + $0x128] sm:$0xf]  ;;  %v1637_v29 = vld [vmem:[#allocation5 + $0x134] sm:$0xf0]  ;;  %v1578_v5 = vld [vmem:[#allocation5 + $0x3d8] sm:$0xf0] }
  0x54   :  { %995 = vmatpush.bf16.msra.mxu3 %v1593_v28  ;;  %v1513_v28 = vor.u32 %v1705_v17, %v1512_v16  ;;  %v1368_v30 = vld [vmem:[#allocation5 + $0x228] sm:$0xf]  ;;  %v1669_v31 = vld [vmem:[#allocation5 + $0x234] sm:$0xf0]  ;;  %v1241_v37 = vor.u32 %v1637_v29, %v1240_v27  ;;  %v1619_v9 = vld [vmem:[#allocation5 + $0xac] sm:$0xf] }
  0x55   :  { %957 = vmatpush.bf16.msra.mxu0 %v1193_v34  ;;  %v1496_v32 = vld [vmem:[#allocation5 + $0x328] sm:$0xf]  ;;  %v1701_v33 = vld [vmem:[#allocation5 + $0x334] sm:$0xf0]  ;;  %v1113_v34 = vor.u32 %v1605_v26, %v1112_v25  ;;  %v1369_v38 = vor.u32 %v1669_v31, %v1368_v30  ;;  %v1178_v10 = vld [vmem:[#allocation5 + $0xb8] sm:$0xf0] }
  0x56   :  { %970 = vmatpush.bf16.msra.mxu1 %v1321_v35  ;;  %v1096_v35 = vld [vmem:[#allocation5 + $0x8] sm:$0xf]  ;;  %v1497_v42 = vor.u32 %v1701_v33, %v1496_v32  ;;  %v1665_v43 = vld [vmem:[#allocation5 + $0x214] sm:$0xf0]  ;;  %v1651_v11 = vld [vmem:[#allocation5 + $0x1ac] sm:$0xf] }
  0x57   :  { %983 = vmatpush.bf16.msra.mxu2 %v1449_v36  ;;  %v1601_v36 = vld [vmem:[#allocation5 + $0x14] sm:$0xf0]  ;;  %v1224_v39 = vld [vmem:[#allocation5 + $0x108] sm:$0xf]  ;;  %v1306_v13 = vld [vmem:[#allocation5 + $0x1b8] sm:$0xf0] }
  0x58   :  { %996 = vmatpush.bf16.msra.mxu3 %v1577_v40  ;;  %v1633_v40 = vld [vmem:[#allocation5 + $0x114] sm:$0xf0]  ;;  %v1352_v41 = vld [vmem:[#allocation5 + $0x208] sm:$0xf]  ;;  %v1097_v49 = vor.u32 %v1601_v36, %v1096_v35  ;;  %v1683_v14 = vld [vmem:[#allocation5 + $0x2ac] sm:$0xf] }
  0x59   :  { %958 = vmatpush.bf16.msra.mxu0 %v1177_v46  ;;  %v1480_v44 = vld [vmem:[#allocation5 + $0x308] sm:$0xf]  ;;  %v1697_v45 = vld [vmem:[#allocation5 + $0x314] sm:$0xf0]  ;;  %v1627_v46 = vld [vmem:[#allocation5 + $0xec] sm:$0xf]  ;;  %v1225_v53 = vor.u32 %v1633_v40, %v1224_v39  ;;  %v1353_v54 = vor.u32 %v1665_v43, %v1352_v41 }
  0x5a   :  { %971 = vmatpush.bf16.msra.mxu1 %v1305_v47  ;;  %v1210_v47 = vld [vmem:[#allocation5 + $0xf8] sm:$0xf0]  ;;  %v1481_v57 = vor.u32 %v1697_v45, %v1480_v44  ;;  %v1715_v16 = vld [vmem:[#allocation5 + $0x3ac] sm:$0xf] }
  0x5b   :  { %984 = vmatpush.bf16.msra.mxu2 %v1433_v48  ;;  %v1659_v48 = vld [vmem:[#allocation5 + $0x1ec] sm:$0xf]  ;;  %v1434_v15 = vld [vmem:[#allocation5 + $0x2b8] sm:$0xf0] }
  0x5c   :  { %997 = vmatpush.bf16.msra.mxu3 %v1561_v52  ;;  %v1466_v52 = vld [vmem:[#allocation5 + $0x2f8] sm:$0xf0]  ;;  %v1615_v25 = vld [vmem:[#allocation5 + $0x8c] sm:$0xf] }
  0x5d   :  { %959 = vmatpush.bf16.msra.mxu0 %v1161_v58  ;;  %v1213_v58 = vor.u32 %v1627_v46, %v1210_v47  ;;  %v1562_v17 = vld [vmem:[#allocation5 + $0x3b8] sm:$0xf0]  ;;  %v1647_v27 = vld [vmem:[#allocation5 + $0x18c] sm:$0xf] }
  0x5e   :  { %972 = vmatpush.bf16.msra.mxu1 %v1289_v59  ;;  %v1341_v59 = vor.u32 %v1659_v48, %v1338_v50  ;;  %v1162_v26 = vld [vmem:[#allocation5 + $0x98] sm:$0xf0]  ;;  %v1679_v30 = vld [vmem:[#allocation5 + $0x28c] sm:$0xf] }
  0x5f   :  { %985 = vmatpush.bf16.msra.mxu2 %v1417_v60  ;;  %v1469_v60 = vor.u32 %v1691_v51, %v1466_v52  ;;  %v1290_v29 = vld [vmem:[#allocation5 + $0x198] sm:$0xf0]  ;;  %v1711_v32 = vld [vmem:[#allocation5 + $0x38c] sm:$0xf] }
  0x60   :  { %998 = vmatpush.bf16.msra.mxu3 %v1545_v0  ;;  %v1597_v0 = vor.u32 %v1723_v55, %v1594_v56  ;;  %v1418_v31 = vld [vmem:[#allocation5 + $0x298] sm:$0xf0]  ;;  %v1293_v35 = vor.u32 %v1647_v27, %v1290_v29  ;;  %v1643_v39 = vld [vmem:[#allocation5 + $0x16c] sm:$0xf] }
  0x61   :  { %960 = vmatpush.bf16.msra.mxu0 %v1145_v6  ;;  %v1197_v6 = vor.u32 %v1623_v61, %v1194_v62  ;;  %v1546_v33 = vld [vmem:[#allocation5 + $0x398] sm:$0xf0]  ;;  %v1421_v36 = vor.u32 %v1679_v30, %v1418_v31  ;;  %v1707_v44 = vld [vmem:[#allocation5 + $0x36c] sm:$0xf] }
  0x62   :  { %973 = vmatpush.bf16.msra.mxu1 %v1273_v7  ;;  %v1325_v7 = vor.u32 %v1655_v63, %v1322_v1  ;;  %v1549_v40 = vor.u32 %v1711_v32, %v1546_v33  ;;  %v1274_v41 = vld [vmem:[#allocation5 + $0x178] sm:$0xf0]  ;;  %v1639_v51 = vld [vmem:[#allocation5 + $0x14c] sm:$0xf] }
  0x63   :  { %986 = vmatpush.bf16.msra.mxu2 %v1401_v8  ;;  %v1453_v8 = vor.u32 %v1687_v2, %v1450_v3  ;;  %v1402_v43 = vld [vmem:[#allocation5 + $0x278] sm:$0xf0]  ;;  %v1277_v47 = vor.u32 %v1643_v39, %v1274_v41  ;;  %v1703_v56 = vld [vmem:[#allocation5 + $0x34c] sm:$0xf] }
  0x64   :  { %999 = vmatpush.bf16.msra.mxu3 %v1529_v12  ;;  %v1581_v12 = vor.u32 %v1719_v4, %v1578_v5  ;;  %v1530_v45 = vld [vmem:[#allocation5 + $0x378] sm:$0xf0]  ;;  %v1603_v61 = vld [vmem:[#allocation5 + $0x2c] sm:$0xf] }
  0x65   :  { %961 = vmatpush.bf16.msra.mxu0 %v1129_v21  ;;  %v1181_v21 = vor.u32 %v1619_v9, %v1178_v10  ;;  %v1130_v50 = vld [vmem:[#allocation5 + $0x58] sm:$0xf0]  ;;  %v1533_v52 = vor.u32 %v1707_v44, %v1530_v45  ;;  %v1635_v63 = vld [vmem:[#allocation5 + $0x12c] sm:$0xf] }
  0x66   :  { %974 = vmatpush.bf16.msra.mxu1 %v1257_v23  ;;  %v1309_v23 = vor.u32 %v1651_v11, %v1306_v13  ;;  %v1386_v55 = vld [vmem:[#allocation5 + $0x258] sm:$0xf0]  ;;  %v1667_v2 = vld [vmem:[#allocation5 + $0x22c] sm:$0xf] }
  0x67   :  { %987 = vmatpush.bf16.msra.mxu2 %v1385_v24  ;;  %v1437_v24 = vor.u32 %v1683_v14, %v1434_v15  ;;  %v1114_v62 = vld [vmem:[#allocation5 + $0x38] sm:$0xf0]  ;;  %v1699_v4 = vld [vmem:[#allocation5 + $0x32c] sm:$0xf] }
  0x68   :  { %1000 = vmatpush.bf16.msra.mxu3 %v1513_v28  ;;  %v1565_v28 = vor.u32 %v1715_v16, %v1562_v17  ;;  %v1242_v1 = vld [vmem:[#allocation5 + $0x138] sm:$0xf0]  ;;  %v1599_v9 = vld [vmem:[#allocation5 + $0xc] sm:$0xf] }
  0x69   :  { %962 = vmatpush.bf16.msra.mxu0 %v1113_v34  ;;  %v1165_v34 = vor.u32 %v1615_v25, %v1162_v26  ;;  %v1370_v3 = vld [vmem:[#allocation5 + $0x238] sm:$0xf0]  ;;  %v1631_v11 = vld [vmem:[#allocation5 + $0x10c] sm:$0xf]  ;;  %v188_v26 = vld [vmem:[#allocation7] sm:$0xf] }
  0x6a   :  { %975 = vmatpush.bf16.msra.mxu1 %v1241_v37  ;;  %v1611_v37 = vld [vmem:[#allocation5 + $0x6c] sm:$0xf]  ;;  %v1498_v5 = vld [vmem:[#allocation5 + $0x338] sm:$0xf0]  ;;  %v190_v27 = vperm.slane %v188_v26, 0  ;;  %v191_v39 = vperm.slane %v188_v26, 1 }
  0x6b   :  { %988 = vmatpush.bf16.msra.mxu2 %v1369_v38  ;;  %v1146_v38 = vld [vmem:[#allocation5 + $0x78] sm:$0xf0]  ;;  %v1663_v14 = vld [vmem:[#allocation5 + $0x20c] sm:$0xf] }
  0x6c   :  { %1001 = vmatpush.bf16.msra.mxu3 %v1497_v42  ;;  %v1675_v42 = vld [vmem:[#allocation5 + $0x26c] sm:$0xf]  ;;  %v1149_v46 = vor.u32 %v1611_v37, %v1146_v38  ;;  %v1098_v10 = vld [vmem:[#allocation5 + $0x18] sm:$0xf0] }
  0x6d   :  { %963 = vmatpush.bf16.msra.mxu0 %v1097_v49  ;;  %v1405_v48 = vor.u32 %v1675_v42, %v1402_v43  ;;  %v1607_v49 = vld [vmem:[#allocation5 + $0x4c] sm:$0xf]  ;;  %v1226_v13 = vld [vmem:[#allocation5 + $0x118] sm:$0xf0] }
  0x6e   :  { %976 = vmatpush.bf16.msra.mxu1 %v1225_v53  ;;  %v1258_v53 = vld [vmem:[#allocation5 + $0x158] sm:$0xf0]  ;;  %v1695_v16 = vld [vmem:[#allocation5 + $0x30c] sm:$0xf] }
  0x6f   :  { %989 = vmatpush.bf16.msra.mxu2 %v1353_v54  ;;  %v1671_v54 = vld [vmem:[#allocation5 + $0x24c] sm:$0xf]  ;;  %v1354_v15 = vld [vmem:[#allocation5 + $0x218] sm:$0xf0] }
  0x70   :  { %1002 = vmatpush.bf16.msra.mxu3 %v1481_v57  ;;  %964 = vmatmul.bf16.vlgmr.msra.gmra.mxu0 %v1873_v20  ;;  %v1514_v57 = vld [vmem:[#allocation5 + $0x358] sm:$0xf0] }
  0x71   :  { %1008 = vmatpush.bf16.msrb.mxu0 %v1213_v58  ;;  %977 = vmatmul.bf16.vlgmr.msra.gmra.mxu1 %v1875_v22  ;;  %v1133_v58 = vor.u32 %v1607_v49, %v1130_v50  ;;  %v1482_v17 = vld [vmem:[#allocation5 + $0x318] sm:$0xf0] }
  0x72   :  { %1021 = vmatpush.bf16.msrb.mxu1 %v1341_v59  ;;  %990 = vmatmul.bf16.vlgmr.msra.gmra.mxu2 %v1869_v18  ;;  %v1261_v59 = vor.u32 %v1639_v51, %v1258_v53  ;;  %v1485_v25 = vor.u32 %v1695_v16, %v1482_v17  ;;  %v192_v51 = vperm.slane %v188_v26, 2 }
  0x73   :  { %1034 = vmatpush.bf16.msrb.mxu2 %v1469_v60  ;;  %1003 = vmatmul.bf16.vlgmr.msra.gmra.mxu3 %v1871_v19  ;;  %v1389_v60 = vor.u32 %v1671_v54, %v1386_v55 }
  0x74   :  { %1047 = vmatpush.bf16.msrb.mxu3 %v1597_v0  ;;  %v1517_v0 = vor.u32 %v1703_v56, %v1514_v57 }
  0x75   :  { %1009 = vmatpush.bf16.msrb.mxu0 %v1197_v6  ;;  %v1117_v6 = vor.u32 %v1603_v61, %v1114_v62 }
  0x76   :  { %1022 = vmatpush.bf16.msrb.mxu1 %v1325_v7  ;;  %v1245_v7 = vor.u32 %v1635_v63, %v1242_v1  ;;  %v193_v1 = vperm.slane %v188_v26, 3 }
  0x77   :  { %1035 = vmatpush.bf16.msrb.mxu2 %v1453_v8  ;;  %v1373_v8 = vor.u32 %v1667_v2, %v1370_v3 }
  0x78   :  { %1048 = vmatpush.bf16.msrb.mxu3 %v1581_v12  ;;  %v1501_v12 = vor.u32 %v1699_v4, %v1498_v5 }
  0x79   :  { %1010 = vmatpush.bf16.msrb.mxu0 %v1181_v21  ;;  %v1101_v21 = vor.u32 %v1599_v9, %v1098_v10 }
  0x7a   :  { %1023 = vmatpush.bf16.msrb.mxu1 %v1309_v23  ;;  %v1229_v23 = vor.u32 %v1631_v11, %v1226_v13 }
  0x7b   :  { %1036 = vmatpush.bf16.msrb.mxu2 %v1437_v24  ;;  %v1357_v24 = vor.u32 %v1663_v14, %v1354_v15 }
  0x7c   :  { %1049 = vmatpush.bf16.msrb.mxu3 %v1565_v28 }
  0x7d   :  { %1011 = vmatpush.bf16.msrb.mxu0 %v1165_v34 }
  0x7e   :  { %1024 = vmatpush.bf16.msrb.mxu1 %v1293_v35 }
  0x7f   :  { %1037 = vmatpush.bf16.msrb.mxu2 %v1421_v36 }
  0x80   :  { %1050 = vmatpush.bf16.msrb.mxu3 %v1549_v40 }
  0x81   :  { %1012 = vmatpush.bf16.msrb.mxu0 %v1149_v46 }
  0x82   :  { %1025 = vmatpush.bf16.msrb.mxu1 %v1277_v47 }
  0x83   :  { %1038 = vmatpush.bf16.msrb.mxu2 %v1405_v48 }
  0x84   :  { %1051 = vmatpush.bf16.msrb.mxu3 %v1533_v52 }
  0x85   :  { %1013 = vmatpush.bf16.msrb.mxu0 %v1133_v58 }
  0x86   :  { %1026 = vmatpush.bf16.msrb.mxu1 %v1261_v59 }
  0x87   :  { %1039 = vmatpush.bf16.msrb.mxu2 %v1389_v60 }
  0x88   :  { %1052 = vmatpush.bf16.msrb.mxu3 %v1517_v0 }
  0x89   :  { %1014 = vmatpush.bf16.msrb.mxu0 %v1117_v6 }
  0x8a   :  { %1027 = vmatpush.bf16.msrb.mxu1 %v1245_v7 }
  0x8b   :  { %1040 = vmatpush.bf16.msrb.mxu2 %v1373_v8 }
  0x8c   :  { %1053 = vmatpush.bf16.msrb.mxu3 %v1501_v12 }
  0x8d   :  { %1015 = vmatpush.bf16.msrb.mxu0 %v1101_v21 }
  0x8e   :  { %1028 = vmatpush.bf16.msrb.mxu1 %v1229_v23 }
  0x8f   :  { %1041 = vmatpush.bf16.msrb.mxu2 %v1357_v24 }
  0x90   :  { %1054 = vmatpush.bf16.msrb.mxu3 %v1485_v25  ;;  %1016 = vmatmul.bf16.vlgmr.msrb.gmra.mxu0 %v1873_v20 }
  0x91   :  { %1029 = vmatmul.bf16.vlgmr.msrb.gmra.mxu1 %v1875_v22 }
  0x92   :  { %1042 = vmatmul.bf16.vlgmr.msrb.gmra.mxu2 %v1869_v18 }
  0x93   :  { %1055 = vmatmul.bf16.vlgmr.msrb.gmra.mxu3 %v1871_v19 }
  0xb2   :  { %v874_v30 = vpop.f32.mrf.mxu1 }
  0xb3   :  { %v861_v28 = vpop.f32.mrf.mxu0 }
  0xb4   :  { %v862_v29 = vadd.f32 %v861_v28, %v190_v27 }
  0xb6   :  { %v875_v31 = vadd.f32 %v874_v30, %v862_v29  ;;  %v900_v34 = vpop.f32.mrf.mxu3 }
  0xb7   :  { %v887_v32 = vpop.f32.mrf.mxu2 }
  0xb8   :  { %v888_v33 = vadd.f32 %v887_v32, %v875_v31 }
  0xba   :  { %v901_v35 = vadd.f32 %v900_v34, %v888_v33  ;;  %v876_v37 = vpop.f32.mrf.mxu1 }
  0xbb   :  { %v863_v36 = vpop.f32.mrf.mxu0 }
  0xbc   :  { %v1060_v38 = vmax.f32 %v901_v35, 0.0 }
  0xbe   :  { %1064 = vst [vmem:[#allocation8] sm:$0xff] %v1060_v38  ;;  %v902_v22 = vpop.f32.mrf.mxu3 }
  0xbf   :  { %v889_v20 = vpop.f32.mrf.mxu2 }
  0xcd   :  { %v913_v18 = vpop.f32.mrf.mxu0 }
  0xce   :  { %v914_v40 = vadd.f32 %v913_v18, %v191_v39  ;;  %v926_v19 = vpop.f32.mrf.mxu1 }
  0xd0   :  { %v927_v41 = vadd.f32 %v926_v19, %v914_v40 }
  0xd5   :  { %v939_v42 = vpop.f32.mrf.mxu2  ;;  %v915_v46 = vpop.f32.mrf.mxu0 }
  0xd6   :  { %v940_v43 = vadd.f32 %v939_v42, %v927_v41  ;;  %v952_v44 = vpop.f32.mrf.mxu3  ;;  %v928_v47 = vpop.f32.mrf.mxu1 }
  0xd8   :  { %v953_v45 = vadd.f32 %v952_v44, %v940_v43 }
  0xda   :  { %v1061_v48 = vmax.f32 %v953_v45, 0.0 }
  0xdc   :  { %1065 = vst [vmem:[#allocation8 + $0x8] sm:$0xff] %v1061_v48 }
  0xdd   :  { %v941_v49 = vpop.f32.mrf.mxu2 }
  0xde   :  { %v954_v50 = vpop.f32.mrf.mxu3 }
  0xed   :  { %v965_v52 = vpop.f32.mrf.mxu0 }
  0xee   :  { %v966_v53 = vadd.f32 %v965_v52, %v192_v51  ;;  %v978_v54 = vpop.f32.mrf.mxu1 }
  0xf0   :  { %v979_v55 = vadd.f32 %v978_v54, %v966_v53 }
  0xf5   :  { %v991_v56 = vpop.f32.mrf.mxu2  ;;  %v967_v60 = vpop.f32.mrf.mxu0 }
  0xf6   :  { %v992_v57 = vadd.f32 %v991_v56, %v979_v55  ;;  %v1004_v58 = vpop.f32.mrf.mxu3  ;;  %v980_v61 = vpop.f32.mrf.mxu1 }
  0xf8   :  { %v1005_v59 = vadd.f32 %v1004_v58, %v992_v57 }
  0xfa   :  { %v1062_v62 = vmax.f32 %v1005_v59, 0.0 }
  0xfc   :  { %1066 = vst [vmem:[#allocation8 + $0x10] sm:$0xff] %v1062_v62 }
  0xfd   :  { %v993_v63 = vpop.f32.mrf.mxu2 }
  0xfe   :  { %v1006_v0 = vpop.f32.mrf.mxu3 }
 0x10d   :  { %v1017_v2 = vpop.f32.mrf.mxu0 }
 0x10e   :  { %v1018_v3 = vadd.f32 %v1017_v2, %v193_v1  ;;  %v1030_v4 = vpop.f32.mrf.mxu1 }
 0x110   :  { %v1031_v5 = vadd.f32 %v1030_v4, %v1018_v3 }
 0x115   :  { %v1043_v6 = vpop.f32.mrf.mxu2  ;;  %v1019_v9 = vpop.f32.mrf.mxu0 }
 0x116   :  { %v1044_v7 = vadd.f32 %v1043_v6, %v1031_v5  ;;  %v1056_v8 = vpop.f32.mrf.mxu3  ;;  %v1032_v10 = vpop.f32.mrf.mxu1 }
 0x118   :  { %v1057_v11 = vadd.f32 %v1056_v8, %v1044_v7 }
 0x11a   :  { %v1063_v12 = vmax.f32 %v1057_v11, 0.0 }
 0x11c   :  { %1067 = vst [vmem:[#allocation8 + $0x18] sm:$0xff] %v1063_v12 }
 0x11d   :  { %v1045_v13 = vpop.f32.mrf.mxu2  ;;  %1078 = dma.vmem_to_hbm [thread:$0]  %s1074_s2, 512, %s1076_s30, [#allocation4]  }
 0x11e   :  { %v1058_v14 = vpop.f32.mrf.mxu3 }
 0x11f   :  { %1832 = dma.done.wait [#allocation4], 512  }
 0x120   :  { %1833 = vsyncadd [#allocation4], 4294966784 }
 0x121   :  { %1083 = vsyncpa [#allocation3], 1 }
 0x122   :  { %1084 = vsyncpa [#allocation6], 1 }
 0x123   :  { %1085 = vsyncpa [#allocation4], 1 }

</bundles_post_ra>
